<compile_context>
chip_gen: v5e
topology: v5e:2x2
jax: 0.10.0
libtpu: 0.0.40
codegen_flags: <defaults>
</compile_context>

<pallas_src>
import functools

import jax
import jax.numpy as jnp
from jax.experimental import pallas as pl
from jax.experimental.pallas import tpu as pltpu

# deterministic "diffusion kernel" hyper-parameters (in lieu of the abstract self.kernel)
ALPHA = 0.5     # kernel magnitude
BETA = 1.0      # temporal decay rate
SIGMA = 0.5     # spatial bandwidth

SENT = -1e30    # sentinel exponent for masked / padded history entries (exp -> 0)


def _round_up(x, m):
    return ((x + m - 1) // m) * m


def _cond_lambda_kernel(xi_s_ref, c_h_ref, ht_s_ref, out_ref, acc_ref):
    """One (B-tile, S-tile) grid step of the kernel-sum.

    xi_s_ref : [TB, Ds]       per-row spatial coords, pre-scaled by 1/sigma^2 (f32)
    c_h_ref  : [TB, TS]       per-history constant c_h (f32; SENT where masked/padded)
    ht_s_ref : [Ds, TB, TS]   history spatial coords (bf16 or f32 storage; S on lanes)
    out_ref  : [TB, 128]      raw sum replicated across lanes (written at last S step)
    acc_ref  : [TB, TS]       f32 running elementwise accumulator over S tiles
    """
    j = pl.program_id(1)

    @pl.when(j == 0)
    def _init():
        acc_ref[...] = jnp.zeros_like(acc_ref)

    xi_s = xi_s_ref[...]                       # [TB, Ds]  (j-invariant; tiny tile)
    expo = c_h_ref[...]                        # [TB, TS]
    n_space = ht_s_ref.shape[0]
    for d in range(n_space):                   # unrolled: 6 mul + 7 add, pure VPU
        # [TB, 1] operand keeps a replicated lane layout -> no materialized broadcast
        expo = expo + xi_s[:, d:d + 1] * ht_s_ref[d].astype(jnp.float32)

    # sentinel entries underflow to exactly 0 -> no mask / select in the hot loop
    acc_ref[...] += jnp.exp(expo)

    @pl.when(j == pl.num_programs(1) - 1)
    def _finish():
        # one cross-lane (XLU) reduce per B tile, lane-dense unmasked store
        s = jnp.sum(acc_ref[...], axis=-1, keepdims=True)        # [TB, 1]
        out_ref[...] = jnp.broadcast_to(s, out_ref.shape)


@functools.partial(jax.jit, static_argnames=("spatial_dtype",))
def _cond_lambda_impl(xi, hti, mu_g, *, spatial_dtype):
    B, D = xi.shape
    _, S, _ = hti.shape
    n_space = D - 2

    t_i = xi[:, 0]                             # [B]
    s_i = xi[:, 2:]                            # [B, Ds]
    t_h = hti[:, :, 0]                         # [B, S]
    s_h = hti[:, :, 2:]                        # [B, S, Ds]

    inv_2s2 = 1.0 / (2.0 * SIGMA * SIGMA)
    inv_s2 = 1.0 / (SIGMA * SIGMA)

    # ---- per-history constant (expand-the-square, per-row time shift folded in) -----
    #   c_h = -BETA*(t_i - t_h) - ||s_h||^2/(2 sigma^2);  masked entries -> SENT
    c_h = -BETA * (t_i[:, None] - t_h) - inv_2s2 * jnp.sum(s_h * s_h, axis=-1)
    c_h = jnp.where(t_h > 0.0, c_h, SENT)

    # ---- per-row factor hoisted out of the S-sum (includes (t_i > 0) mask and ALPHA) -
    rfac = ALPHA * jnp.exp(-inv_2s2 * jnp.sum(s_i * s_i, axis=-1))
    rfac = jnp.where(t_i > 0.0, rfac, 0.0)

    # ---- tiling ----------------------------------------------------------------------
    if B > 128:
        TB = 128
    else:
        # guarantee >= 2 B tiles whenever B > 8 so both v7x TensorCores get work
        TB = max(8, _round_up(-(-B // 2), 8))
    B_pad = _round_up(B, TB)

    TS_CAP = 2048                               # fits VMEM in f32 and bf16 (see below)
    S_128 = _round_up(S, 128)                   # pad only to the lane granularity
    n_s_tiles = -(-S_128 // TS_CAP)
    TS = _round_up(-(-S_128 // n_s_tiles), 128)  # TS divides S_pad -> no overshoot
    S_pad = TS * n_s_tiles

    # ---- lane-dense relayout + pad + cast (single fused pass over hti under jit) -----
    xi_s_p = jnp.pad(s_i * inv_s2, ((0, B_pad - B), (0, 0))).astype(jnp.float32)
    c_h_p = jnp.pad(c_h, ((0, B_pad - B), (0, S_pad - S)),
                    constant_values=SENT).astype(jnp.float32)
    ht_s_p = jnp.pad(jnp.transpose(s_h, (2, 0, 1)).astype(spatial_dtype),
                     ((0, 0), (0, B_pad - B), (0, S_pad - S)))

    grid = (B_pad // TB, S_pad // TS)

    # VMEM @ TB=128, TS=2048: history per buffer = TB*TS*(4 + 6*elt) bytes
    #   bf16 spatial: 4 MiB x2 buffers + 1 MiB acc  ~  9 MiB
    #   f32  spatial: 7 MiB x2 buffers + 1 MiB acc  ~ 15 MiB
    out = pl.pallas_call(
        _cond_lambda_kernel,
        out_shape=jax.ShapeDtypeStruct((B_pad, 128), jnp.float32),
        grid_spec=pltpu.PrefetchScalarGridSpec(
            num_scalar_prefetch=0,
            grid=grid,
            in_specs=[
                pl.BlockSpec((TB, n_space), lambda i, j: (i, 0)),            # xi coords
                pl.BlockSpec((TB, TS), lambda i, j: (i, j)),                 # c_h plane
                pl.BlockSpec((n_space, TB, TS), lambda i, j: (0, i, j)),     # history coords
            ],
            out_specs=pl.BlockSpec((TB, 128), lambda i, j: (i, 0)),
            scratch_shapes=[pltpu.VMEM((TB, TS), jnp.float32)],
        ),
        compiler_params=pltpu.CompilerParams(
            dimension_semantics=("parallel", "arbitrary"),
            vmem_limit_bytes=32 * 1024 * 1024),
    )(xi_s_p, c_h_p, ht_s_p)

    return rfac * out[:B, 0] + mu_g


def cond_lambda(xi, hti, mu, spatial_dtype=jnp.bfloat16):
    """Pallas wrapper reproducing BasePointProcess.cond_lambda.

    Args:
      xi  : [B, D] current points (col 0 = time, col 1 = class id, cols 2: = marks)
      hti : [B, S, D] history points (time == 0 rows are padding -> masked)
      mu  : [C] per-class base rates
      spatial_dtype: storage dtype of the spatial history planes (bf16 default; f32 for
        bit-accurate checks).  Compute is always f32.
    Returns:
      lami: [B] float32 conditional intensities
    """
    B, D = xi.shape
    _, S, _ = hti.shape

    xi = xi.astype(jnp.float32)
    mu = jnp.asarray(mu, jnp.float32)

    # class-id gather kept outside the kernel (matches ._mu[xi[:,1].long()])
    cls = xi[:, 1].astype(jnp.int32)
    mu_g = mu[cls]                                                # [B]

    if S == 0:
        # seq_len == 0 corner case (pure base-rate path)
        return mu_g

    return _cond_lambda_impl(xi, hti.astype(jnp.float32), mu_g,
                             spatial_dtype=spatial_dtype)


# TODO(synk): BasePointProcess.log_likelihood / forward raise NotImplementedError in the
#             reference (they are abstract); only cond_lambda has concrete semantics.


def _cond_lambda_ref(xi, hti, mu):
    """Pure-JAX reference mirroring the PyTorch math (for correctness check)."""
    mask = (hti[:, :, 0] > 0) * (xi[:, 0] > 0)[:, None]
    dt = xi[:, None, 0] - hti[:, :, 0]
    ds2 = jnp.sum((xi[:, None, 2:] - hti[:, :, 2:]) ** 2, axis=-1)
    K = ALPHA * jnp.exp(-BETA * dt) * jnp.exp(-ds2 / (2.0 * SIGMA ** 2))
    return (K * mask).sum(-1) + mu[xi[:, 1].astype(jnp.int32)]


if __name__ == "__main__":
    B, S, D, C = 2, 8, 8, 4          # batch, history seq_len, data_dim=8, n_class
    T = 10.0

    key = jax.random.PRNGKey(0)
    k1, k2, k3, k4, k5 = jax.random.split(key, 5)

    # deterministic base rates mu (the non-trainable nn.Parameter; n_class = len(mu) = C)
    mu = jnp.linspace(0.1, 0.4, C).astype(jnp.float32)

    # current points xi: [B, D] (col 0 = time in (0, T], col 1 = class id, rest = marks)
    xi_time = jax.random.uniform(k1, (B, 1), minval=0.1, maxval=T)
    xi_cls = jax.random.randint(k2, (B, 1), 0, C).astype(jnp.float32)
    xi_marks = jax.random.uniform(k3, (B, D - 2), minval=-1.0, maxval=1.0)
    xi = jnp.concatenate([xi_time, xi_cls, xi_marks], axis=-1)

    # history hti: [B, S, D]; zero out the last two time slots to exercise the mask
    hti = jax.random.uniform(k4, (B, S, D), minval=0.0, maxval=1.0)
    hti = hti.at[:, :, 0].set(
        jax.random.uniform(k5, (B, S), minval=0.1, maxval=T))
    hti = hti.at[:, -2:, 0].set(0.0)   # padded (masked) history entries

    lam_ref = _cond_lambda_ref(xi, hti, mu)

    # default fast path: bf16 storage of the spatial history planes (compute in f32).
    # bf16 has 7 mantissa bits -> up to a few % error on the kernel sum, hence the
    # relaxed tolerance here; the exact math is validated by the f32 path below.
    lam = cond_lambda(xi, hti, mu)
    jax.block_until_ready(lam)
    assert lam.shape == (B,)
    assert jnp.allclose(lam, lam_ref, rtol=1.5e-1, atol=5e-3)

    # f32 storage path: tight check of the expand-the-square / sentinel-mask math
    lam_f32 = cond_lambda(xi, hti, mu, spatial_dtype=jnp.float32)
    jax.block_until_ready(lam_f32)
    assert jnp.allclose(lam_f32, lam_ref, rtol=1e-4, atol=1e-6)

    # seq_len == 0 corner case (pure base-rate path)
    lam0 = cond_lambda(xi, hti[:, :0, :], mu)
    assert jnp.allclose(lam0, mu[xi[:, 1].astype(jnp.int32)], rtol=1e-6, atol=1e-6)

    print("KERNEL_OK")
</pallas_src>

<mosaic_0001>
module attributes {stable_mosaic.version = 11 : i64} {
  func.func @_cond_lambda_kernel(%arg0: i32, %arg1: i32, %arg2: memref<8x6xf32, #tpu.memory_space<vmem>>, %arg3: memref<8x128xf32, #tpu.memory_space<vmem>>, %arg4: memref<6x8x128xbf16, #tpu.memory_space<vmem>>, %arg5: memref<8x128xf32, #tpu.memory_space<vmem>>, %arg6: memref<8x128xf32, #tpu.memory_space<vmem>>) attributes {dimension_semantics = [#tpu.dimension_semantics<parallel>, #tpu.dimension_semantics<arbitrary>], iteration_bounds = array<i64: 1, 1>, scalar_prefetch = 0 : i64, scratch_operands = 1 : i64, tpu.core_type = #tpu.core_type<tc>, window_params = [{transform_indices = @transform_0, window_bounds = array<i64: 8, 6>}, {transform_indices = @transform_1, window_bounds = array<i64: 8, 128>}, {transform_indices = @transform_2, window_bounds = array<i64: 6, 8, 128>}, {transform_indices = @transform_3, window_bounds = array<i64: 8, 128>}]} {
    %c0_i32 = arith.constant 0 : i32
    %0 = arith.cmpi eq, %arg1, %c0_i32 : i32
    %1 = arith.extui %0 : i1 to i32
    %c0_i32_0 = arith.constant 0 : i32
    %2 = arith.cmpi ne, %1, %c0_i32_0 : i32
    scf.if %2 {
      %cst = arith.constant 0.000000e+00 : f32
      %54 = vector.broadcast %cst : f32 to vector<8x128xf32>
      %c0_23 = arith.constant 0 : index
      %c0_24 = arith.constant 0 : index
      %55 = vector.load %arg6[%c0_23, %c0_24] : memref<8x128xf32, #tpu.memory_space<vmem>>, vector<8x128xf32>
      tpu.vector_store %arg6[%c0_23, %c0_24], %54 {strides = array<i32>} : memref<8x128xf32, #tpu.memory_space<vmem>>, vector<8x128xf32>,
    } else {
    }
    %c0 = arith.constant 0 : index
    %c0_1 = arith.constant 0 : index
    %3 = vector.load %arg2[%c0, %c0_1] : memref<8x6xf32, #tpu.memory_space<vmem>>, vector<8x6xf32>
    %c0_2 = arith.constant 0 : index
    %c0_3 = arith.constant 0 : index
    %4 = vector.load %arg3[%c0_2, %c0_3] : memref<8x128xf32, #tpu.memory_space<vmem>>, vector<8x128xf32>
    %5 = vector.extract_strided_slice %3 {offsets = [0, 0], sizes = [8, 1], strides = [1, 1]} : vector<8x6xf32> to vector<8x1xf32>
    %c0_4 = arith.constant 0 : index
    %c0_5 = arith.constant 0 : index
    %c0_6 = arith.constant 0 : index
    %6 = vector.load %arg4[%c0_4, %c0_5, %c0_6] : memref<6x8x128xbf16, #tpu.memory_space<vmem>>, vector<1x8x128xbf16>
    %7 = vector.shape_cast %6 : vector<1x8x128xbf16> to vector<8x128xbf16>
    %8 = arith.extf %7 : vector<8x128xbf16> to vector<8x128xf32>
    %9 = vector.broadcast %5 : vector<8x1xf32> to vector<8x128xf32>
    %10 = arith.mulf %9, %8 : vector<8x128xf32>
    %11 = arith.addf %4, %10 : vector<8x128xf32>
    %12 = vector.extract_strided_slice %3 {offsets = [0, 1], sizes = [8, 1], strides = [1, 1]} : vector<8x6xf32> to vector<8x1xf32>
    %c1 = arith.constant 1 : index
    %c0_7 = arith.constant 0 : index
    %c0_8 = arith.constant 0 : index
    %13 = vector.load %arg4[%c1, %c0_7, %c0_8] : memref<6x8x128xbf16, #tpu.memory_space<vmem>>, vector<1x8x128xbf16>
    %14 = vector.shape_cast %13 : vector<1x8x128xbf16> to vector<8x128xbf16>
    %15 = arith.extf %14 : vector<8x128xbf16> to vector<8x128xf32>
    %16 = vector.broadcast %12 : vector<8x1xf32> to vector<8x128xf32>
    %17 = arith.mulf %16, %15 : vector<8x128xf32>
    %18 = arith.addf %11, %17 : vector<8x128xf32>
    %19 = vector.extract_strided_slice %3 {offsets = [0, 2], sizes = [8, 1], strides = [1, 1]} : vector<8x6xf32> to vector<8x1xf32>
    %c2 = arith.constant 2 : index
    %c0_9 = arith.constant 0 : index
    %c0_10 = arith.constant 0 : index
    %20 = vector.load %arg4[%c2, %c0_9, %c0_10] : memref<6x8x128xbf16, #tpu.memory_space<vmem>>, vector<1x8x128xbf16>
    %21 = vector.shape_cast %20 : vector<1x8x128xbf16> to vector<8x128xbf16>
    %22 = arith.extf %21 : vector<8x128xbf16> to vector<8x128xf32>
    %23 = vector.broadcast %19 : vector<8x1xf32> to vector<8x128xf32>
    %24 = arith.mulf %23, %22 : vector<8x128xf32>
    %25 = arith.addf %18, %24 : vector<8x128xf32>
    %26 = vector.extract_strided_slice %3 {offsets = [0, 3], sizes = [8, 1], strides = [1, 1]} : vector<8x6xf32> to vector<8x1xf32>
    %c3 = arith.constant 3 : index
    %c0_11 = arith.constant 0 : index
    %c0_12 = arith.constant 0 : index
    %27 = vector.load %arg4[%c3, %c0_11, %c0_12] : memref<6x8x128xbf16, #tpu.memory_space<vmem>>, vector<1x8x128xbf16>
    %28 = vector.shape_cast %27 : vector<1x8x128xbf16> to vector<8x128xbf16>
    %29 = arith.extf %28 : vector<8x128xbf16> to vector<8x128xf32>
    %30 = vector.broadcast %26 : vector<8x1xf32> to vector<8x128xf32>
    %31 = arith.mulf %30, %29 : vector<8x128xf32>
    %32 = arith.addf %25, %31 : vector<8x128xf32>
    %33 = vector.extract_strided_slice %3 {offsets = [0, 4], sizes = [8, 1], strides = [1, 1]} : vector<8x6xf32> to vector<8x1xf32>
    %c4 = arith.constant 4 : index
    %c0_13 = arith.constant 0 : index
    %c0_14 = arith.constant 0 : index
    %34 = vector.load %arg4[%c4, %c0_13, %c0_14] : memref<6x8x128xbf16, #tpu.memory_space<vmem>>, vector<1x8x128xbf16>
    %35 = vector.shape_cast %34 : vector<1x8x128xbf16> to vector<8x128xbf16>
    %36 = arith.extf %35 : vector<8x128xbf16> to vector<8x128xf32>
    %37 = vector.broadcast %33 : vector<8x1xf32> to vector<8x128xf32>
    %38 = arith.mulf %37, %36 : vector<8x128xf32>
    %39 = arith.addf %32, %38 : vector<8x128xf32>
    %40 = vector.extract_strided_slice %3 {offsets = [0, 5], sizes = [8, 1], strides = [1, 1]} : vector<8x6xf32> to vector<8x1xf32>
    %c5 = arith.constant 5 : index
    %c0_15 = arith.constant 0 : index
    %c0_16 = arith.constant 0 : index
    %41 = vector.load %arg4[%c5, %c0_15, %c0_16] : memref<6x8x128xbf16, #tpu.memory_space<vmem>>, vector<1x8x128xbf16>
    %42 = vector.shape_cast %41 : vector<1x8x128xbf16> to vector<8x128xbf16>
    %43 = arith.extf %42 : vector<8x128xbf16> to vector<8x128xf32>
    %44 = vector.broadcast %40 : vector<8x1xf32> to vector<8x128xf32>
    %45 = arith.mulf %44, %43 : vector<8x128xf32>
    %46 = arith.addf %39, %45 : vector<8x128xf32>
    %c0_17 = arith.constant 0 : index
    %c0_18 = arith.constant 0 : index
    %47 = vector.load %arg6[%c0_17, %c0_18] : memref<8x128xf32, #tpu.memory_space<vmem>>, vector<8x128xf32>
    %48 = math.exp %46 : vector<8x128xf32>
    %49 = arith.addf %47, %48 : vector<8x128xf32>
    %c0_19 = arith.constant 0 : index
    %c0_20 = arith.constant 0 : index
    %50 = vector.load %arg6[%c0_19, %c0_20] : memref<8x128xf32, #tpu.memory_space<vmem>>, vector<8x128xf32>
    tpu.vector_store %arg6[%c0_19, %c0_20], %49 {strides = array<i32>} : memref<8x128xf32, #tpu.memory_space<vmem>>, vector<8x128xf32>,
    %c0_i32_21 = arith.constant 0 : i32
    %51 = arith.cmpi eq, %arg1, %c0_i32_21 : i32
    %52 = arith.extui %51 : i1 to i32
    %c0_i32_22 = arith.constant 0 : i32
    %53 = arith.cmpi ne, %52, %c0_i32_22 : i32
    scf.if %53 {
      %c0_23 = arith.constant 0 : index
      %c0_24 = arith.constant 0 : index
      %54 = vector.load %arg6[%c0_23, %c0_24] : memref<8x128xf32, #tpu.memory_space<vmem>>, vector<8x128xf32>
      %cst = arith.constant dense<0.000000e+00> : vector<8xf32>
      %55 = vector.multi_reduction <add>, %54, %cst [1] : vector<8x128xf32> to vector<8xf32>
      %56 = vector.shape_cast %55 : vector<8xf32> to vector<8x1xf32>
      %57 = vector.shape_cast %56 : vector<8x1xf32> to vector<8x1xf32>
      %58 = vector.broadcast %57 : vector<8x1xf32> to vector<8x128xf32>
      %c0_25 = arith.constant 0 : index
      %c0_26 = arith.constant 0 : index
      %59 = vector.load %arg5[%c0_25, %c0_26] : memref<8x128xf32, #tpu.memory_space<vmem>>, vector<8x128xf32>
      tpu.vector_store %arg5[%c0_25, %c0_26], %58 {strides = array<i32>} : memref<8x128xf32, #tpu.memory_space<vmem>>, vector<8x128xf32>,
    } else {
    }
    return
  }
  func.func @transform_0(%arg0: i32, %arg1: i32) -> (i32, i32) {
    %c0_i32 = arith.constant 0 : i32
    %c0_i32_0 = arith.constant 0 : i32
    return %arg0, %c0_i32 : i32, i32
  }
  func.func @transform_1(%arg0: i32, %arg1: i32) -> (i32, i32) {
    %c0_i32 = arith.constant 0 : i32
    return %arg0, %arg1 : i32, i32
  }
  func.func @transform_2(%arg0: i32, %arg1: i32) -> (i32, i32, i32) {
    %c0_i32 = arith.constant 0 : i32
    %c0_i32_0 = arith.constant 0 : i32
    return %c0_i32, %arg0, %arg1 : i32, i32, i32
  }
  func.func @transform_3(%arg0: i32, %arg1: i32) -> (i32, i32) {
    %c0_i32 = arith.constant 0 : i32
    %c0_i32_0 = arith.constant 0 : i32
    return %arg0, %c0_i32 : i32, i32
  }
}

</mosaic_0001>

<bundles_post_ra>
// kernel: _cond_lambda_impl.1
= control target key start
LH: loop header
LB: loop body
LE: loop exit
PB: predicated region body
PF: predicated region fallthrough
CT: control target
= control target key end

     0   :  { %v111_v0 = vmov 0   ;;  %v112_v2 = vmov 2   ;;  %v113_v3 = vmov 4   ;;  %v114_v4 = vmov 1   ;;  %s155_s0 = inlined_call_operand.vmem [shape: f32[8,6], index: 0, kind: input, shape index: {}]   ;;  %s156_s2 = inlined_call_operand.vmem [shape: bf16[6,8,128], index: 2, kind: input, shape index: {}]   ;;  %s157_s1 = inlined_call_operand.vmem [shape: f32[8,128], index: 1, kind: input, shape index: {}]   ;;  %s158_s3 = inlined_call_operand.vmem [shape: f32[8,128], index: 3, kind: output, shape index: {}]  }
   0x1   :  { %102 = vset.pattern.permute.xlu0 %v111_v0  ;;  %v19_v1 = vld [vmem:[%s155_s0] sm:$0xff]  ;;  %104 = vset.pattern.permute.xlu1 %v112_v2  ;;  %v115_v5 = vmov 3   ;;  %v116_v6 = vmov 5   ;;  %v92_v12 = vld [vmem:[%s156_s2 + $0x8] sm:$0xff]   ;;  %v94_v17 = vld [vmem:[%s156_s2 + $0x10] sm:$0xff]  }
   0x2   :  { %25 = vperm.xlu0 %102, %v19_v1   ;;  %43 = vperm.xlu1 %104, %v19_v1   ;;  %v21_v7 = vld [vmem:[%s156_s2] sm:$0xff]   ;;  %v41_v16 = vunpack.c.l.bf16 %v92_v12  ;;  %v50_v18 = vunpack.c.h.bf16 %v92_v12  ;;  %v59_v23 = vunpack.c.l.bf16 %v94_v17  ;;  %v68_v27 = vunpack.c.h.bf16 %v94_v17 }
   0x3   :  { %106 = vset.pattern.permute.xlu2 %v113_v3  ;;  %v22_v10 = vunpack.c.l.bf16 %v21_v7  ;;  %v32_v14 = vunpack.c.h.bf16 %v21_v7  ;;  %v20_v15 = vld [vmem:[%s157_s1] sm:$0xff] }
   0x4   :  { %61 = vperm.xlu2 %106, %v19_v1  }
   0xa   :  { %103 = vset.pattern.permute.xlu0 %v114_v4  ;;  %105 = vset.pattern.permute.xlu1 %v115_v5 }
   0xb   :  { %34 = vperm.xlu0 %103, %v19_v1   ;;  %52 = vperm.xlu1 %105, %v19_v1  }
   0xc   :  { %107 = vset.pattern.permute.xlu2 %v116_v6 }
   0xd   :  { %70 = vperm.xlu2 %107, %v19_v1  }
  0x13   :  { %108 = vset.pattern.permute.xlu0 %v116_v6 }
  0x5e   :  { %v62_v11 = vpop.permute.xlu2 %61 }
  0x5f   :  { %v64_v30 = vmul.f32 %v62_v11, %v59_v23 }
  0x67   :  { %v71_v28 = vpop.permute.xlu2 %70 }
  0x68   :  { %v73_v32 = vmul.f32 %v71_v28, %v68_v27 }
  0x74   :  { %v26_v8 = vpop.permute.xlu0 %25  ;;  %v44_v9 = vpop.permute.xlu1 %43 }
  0x75   :  { %v28_v13 = vmul.f32 %v26_v8, %v22_v10  ;;  %v46_v24 = vmul.f32 %v44_v9, %v41_v16 }
  0x77   :  { %v29_v21 = vadd.f32 %v28_v13, %v20_v15 }
  0x7d   :  { %v35_v19 = vpop.permute.xlu0 %34  ;;  %v53_v20 = vpop.permute.xlu1 %52 }
  0x7e   :  { %v37_v22 = vmul.f32 %v35_v19, %v32_v14  ;;  %v55_v26 = vmul.f32 %v53_v20, %v50_v18 }
  0x80   :  { %v38_v25 = vadd.f32 %v37_v22, %v29_v21 }
  0x82   :  { %v47_v29 = vadd.f32 %v46_v24, %v38_v25 }
  0x84   :  { %v56_v31 = vadd.f32 %v55_v26, %v47_v29 }
  0x86   :  { %v65_v33 = vadd.f32 %v64_v30, %v56_v31 }
  0x88   :  { %v74_v34 = vadd.f32 %v73_v32, %v65_v33 }
  0x8a   :  { %v76_v35 = vmul.f32 1.442695, %v74_v34 }
  0x8c   :  { %109 = vpow2.f32 %v76_v35 }
  0x92   :  { %v110_v36 = vpop.eup %109 }
  0x93   :  { %84 = vadd.xlane.f32.xlu1 %v110_v36 }
 0x106   :  { %v85_v37 = vpop.xlane.xlu1 %84 }
 0x107   :  { %86 = vst [vmem:[%s158_s3] sm:$0xff] %v85_v37 }

</bundles_post_ra>
